<compile_context>
chip_gen: v5e
topology: v5e:2x2
jax: 0.10.0
libtpu: 0.0.40
codegen_flags: <defaults>
</compile_context>

<pallas_src>
import functools
import math

import jax
import jax.numpy as jnp
import numpy as np
from jax.experimental import pallas as pl
from jax.experimental.pallas import tpu as pltpu


# ------------------------------ tiling helpers ------------------------------


def _round_up(x, m):
    return (x + m - 1) // m * m


def _tile(dim, pref, align):
    """Pick a tile (multiple of `align`, <= pref) and the padded dim it divides."""
    t = min(pref, _round_up(dim, align))
    return t, _round_up(dim, t)


def _pad2(a, rows, cols):
    pr, pc = rows - a.shape[0], cols - a.shape[1]
    if pr or pc:
        a = jnp.pad(a, ((0, pr), (0, pc)))
    return a


def _vmem_limit(need_bytes):
    """Per-kernel VMEM budget: actual need + headroom, clamped to v7x physical."""
    return int(min(64 << 20, max(32 << 20, need_bytes + (8 << 20))))


# ----------------------------- linear (matmul) ------------------------------


def _matmul_bias_kernel(x_ref, w_ref, b_ref, o_ref, acc_ref, *, relu):
    """Tiled matmul with K-axis accumulation: o = relu?(x @ w + b)."""

    @pl.when(pl.program_id(2) == 0)
    def _init():
        acc_ref[...] = jnp.zeros_like(acc_ref)

    acc_ref[...] += jnp.dot(
        x_ref[...], w_ref[...], preferred_element_type=jnp.float32
    )

    @pl.when(pl.program_id(2) == pl.num_programs(2) - 1)
    def _finalize():
        y = acc_ref[...] + b_ref[...]          # (1, tn) f32 bias broadcasts
        if relu:
            y = jnp.maximum(y, 0.0)
        o_ref[...] = y.astype(o_ref.dtype)


def pallas_linear(x, w, b, relu=False, out_dtype=jnp.bfloat16,
                  tm_pref=512, tk_pref=1024, tn_pref=512):
    """x: (M, K), w: (K, N), b: (N,) -> (M, N) out_dtype."""
    M, K = x.shape
    Kw, N = w.shape
    assert K == Kw

    tm, Mp = _tile(M, tm_pref, 16)
    tk, Kp = _tile(K, tk_pref, 128)
    tn, Np = _tile(N, tn_pref, 128)

    x_p = _pad2(x.astype(jnp.bfloat16), Mp, Kp)
    w_p = _pad2(w.astype(jnp.bfloat16), Kp, Np)
    b_p = _pad2(b.astype(jnp.float32).reshape(1, N), 1, Np)

    out_b = jnp.dtype(out_dtype).itemsize
    # bytes_accessed includes grid re-streaming: x re-read Np/tn times,
    # w re-read Mp/tm times.
    cost = pl.CostEstimate(
        flops=2 * Mp * Np * Kp,
        transcendentals=0,
        bytes_accessed=(Mp * Kp * 2) * (Np // tn)
        + (Kp * Np * 2) * (Mp // tm)
        + Mp * Np * out_b
        + Np * 4,
    )
    need = (2 * tm * tk * 2 + 2 * tk * tn * 2 + 2 * tn * 4
            + 2 * tm * tn * out_b + tm * tn * 4)

    kernel = functools.partial(_matmul_bias_kernel, relu=relu)
    out = pl.pallas_call(
        kernel,
        out_shape=jax.ShapeDtypeStruct((Mp, Np), out_dtype),
        grid=(Mp // tm, Np // tn, Kp // tk),
        in_specs=[
            pl.BlockSpec((tm, tk), lambda i, j, k: (i, k)),
            pl.BlockSpec((tk, tn), lambda i, j, k: (k, j)),
            pl.BlockSpec((1, tn), lambda i, j, k: (0, j)),
        ],
        out_specs=pl.BlockSpec((tm, tn), lambda i, j, k: (i, j)),
        scratch_shapes=[pltpu.VMEM((tm, tn), jnp.float32)],
        compiler_params=pltpu.CompilerParams(
            dimension_semantics=("parallel", "parallel", "arbitrary"),
            vmem_limit_bytes=_vmem_limit(need),
        ),
        cost_estimate=cost,
    )(x_p, w_p, b_p)

    if (Mp, Np) != (M, N):
        out = out[:M, :N]
    return out


# --------------- linear + residual add + LayerNorm (fused) ------------------


def _matmul_res_ln_kernel(x_ref, w_ref, b_ref, r_ref, g_ref, bt_ref,
                          o_ref, acc_ref, *, eps, n_true):
    """o = LayerNorm((x @ w + b) + resid) over the last dim (full-width tile)."""

    @pl.when(pl.program_id(1) == 0)
    def _init():
        acc_ref[...] = jnp.zeros_like(acc_ref)

    acc_ref[...] += jnp.dot(
        x_ref[...], w_ref[...], preferred_element_type=jnp.float32
    )

    @pl.when(pl.program_id(1) == pl.num_programs(1) - 1)
    def _finalize():
        h = acc_ref[...] + b_ref[...] + r_ref[...].astype(jnp.float32)
        n_pad = h.shape[-1]
        if n_true == n_pad:
            mu = jnp.mean(h, axis=-1, keepdims=True)
            var = jnp.mean(jnp.square(h - mu), axis=-1, keepdims=True)
        else:
            # padded feature columns must not pollute the statistics
            lane = jax.lax.broadcasted_iota(jnp.int32, h.shape, 1)
            valid = lane < n_true
            hm = jnp.where(valid, h, 0.0)
            mu = jnp.sum(hm, axis=-1, keepdims=True) / n_true
            d = jnp.where(valid, h - mu, 0.0)
            var = jnp.sum(d * d, axis=-1, keepdims=True) / n_true
        y = (h - mu) * jax.lax.rsqrt(var + eps)
        y = y * g_ref[...] + bt_ref[...]   # padded gamma/beta are zero
        o_ref[...] = y.astype(o_ref.dtype)


def pallas_linear_res_ln(x, w, b, resid, gamma, beta, eps=1e-5,
                         out_dtype=jnp.bfloat16, tm_pref=256, tk_pref=512):
    """LayerNorm(x @ w + b + resid); N tiled full-width so LN stays in-kernel."""
    M, K = x.shape
    Kw, N = w.shape
    assert K == Kw and resid.shape == (M, N)

    tm, Mp = _tile(M, tm_pref, 16)
    tk, Kp = _tile(K, tk_pref, 128)
    Np = _round_up(N, 128)

    x_p = _pad2(x.astype(jnp.bfloat16), Mp, Kp)
    w_p = _pad2(w.astype(jnp.bfloat16), Kp, Np)
    b_p = _pad2(b.astype(jnp.float32).reshape(1, N), 1, Np)
    r_p = _pad2(resid.astype(jnp.bfloat16), Mp, Np)
    g_p = _pad2(gamma.astype(jnp.float32).reshape(1, N), 1, Np)
    bt_p = _pad2(beta.astype(jnp.float32).reshape(1, N), 1, Np)

    out_b = jnp.dtype(out_dtype).itemsize
    cost = pl.CostEstimate(
        flops=2 * Mp * Np * Kp + 8 * Mp * Np,
        transcendentals=Mp,
        bytes_accessed=Mp * Kp * 2 + (Kp * Np * 2) * (Mp // tm)
        + Mp * Np * (2 + out_b) + 3 * Np * 4,
    )
    need = (2 * tm * tk * 2 + 2 * tk * Np * 2 + 2 * tm * Np * 2
            + 2 * tm * Np * out_b + tm * Np * 4 + 4 * tm * Np * 4 + 6 * Np * 4)

    kernel = functools.partial(_matmul_res_ln_kernel, eps=eps, n_true=N)
    out = pl.pallas_call(
        kernel,
        out_shape=jax.ShapeDtypeStruct((Mp, Np), out_dtype),
        grid=(Mp // tm, Kp // tk),
        in_specs=[
            pl.BlockSpec((tm, tk), lambda i, k: (i, k)),
            pl.BlockSpec((tk, Np), lambda i, k: (k, 0)),
            pl.BlockSpec((1, Np), lambda i, k: (0, 0)),
            pl.BlockSpec((tm, Np), lambda i, k: (i, 0)),
            pl.BlockSpec((1, Np), lambda i, k: (0, 0)),
            pl.BlockSpec((1, Np), lambda i, k: (0, 0)),
        ],
        out_specs=pl.BlockSpec((tm, Np), lambda i, k: (i, 0)),
        scratch_shapes=[pltpu.VMEM((tm, Np), jnp.float32)],
        compiler_params=pltpu.CompilerParams(
            dimension_semantics=("parallel", "arbitrary"),
            vmem_limit_bytes=_vmem_limit(need),
        ),
        cost_estimate=cost,
    )(x_p, w_p, b_p, r_p, g_p, bt_p)

    if (Mp, Np) != (M, N):
        out = out[:M, :N]
    return out


# --------------------- flash-style multi-head attention ---------------------


def _flash_attn_kernel(q_ref, kv_ref, o_ref, m_sc, l_sc, acc_sc, *,
                       n_heads, d_model, dk, scale, causal, s_true, s_pad,
                       tq, tkv):
    """One (batch, q-tile, kv-tile) step of online-softmax attention.

    q_ref / kv_ref are lane-dense (1, tile, 3*D) views of the fused QKV tensor;
    Q, K, V and heads are sliced in VMEM (no wrapper-side split).
    """
    qi = pl.program_id(1)
    ki = pl.program_id(2)
    n_kv = pl.num_programs(2)

    @pl.when(ki == 0)
    def _init():
        m_sc[...] = jnp.full_like(m_sc, -jnp.inf)
        l_sc[...] = jnp.zeros_like(l_sc)
        acc_sc[...] = jnp.zeros_like(acc_sc)

    q_start = qi * tq
    kv_start = ki * tkv

    def _compute():
        q_full = q_ref[0]      # (tq, 3D) bf16
        kv_full = kv_ref[0]    # (tkv, 3D) bf16

        mask = None
        if s_pad > s_true or causal:
            row = q_start + jax.lax.broadcasted_iota(jnp.int32, (tq, tkv), 0)
            col = kv_start + jax.lax.broadcasted_iota(jnp.int32, (tq, tkv), 1)
            if s_pad > s_true:
                mask = col >= s_true
            if causal:
                c = col > row
                mask = c if mask is None else jnp.logical_or(mask, c)

        # TODO(synk): when dk >= 128, re-layout QKV as (B, H, S, dk) and grid
        # over heads so the MXU contraction is fully lane-dense per head.
        for h in range(n_heads):
            sl = slice(h * dk, (h + 1) * dk)
            qh = q_full[:, sl]
            kh = kv_full[:, d_model + h * dk:d_model + (h + 1) * dk]
            vh = kv_full[:, 2 * d_model + h * dk:2 * d_model + (h + 1) * dk]

            # contract on last dims -> no transpose of K materialized
            s = jax.lax.dot_general(
                qh, kh, (((1,), (1,)), ((), ())),
                preferred_element_type=jnp.float32) * scale
            if mask is not None:
                s = jnp.where(mask, -1e30, s)

            m_prev = m_sc[h]                                   # (tq, 1)
            l_prev = l_sc[h]
            m_new = jnp.maximum(m_prev, jnp.max(s, axis=-1, keepdims=True))
            alpha = jnp.exp(m_prev - m_new)
            p = jnp.exp(s - m_new)
            l_sc[h] = alpha * l_prev + jnp.sum(p, axis=-1, keepdims=True)
            pv = jax.lax.dot_general(
                p.astype(vh.dtype), vh, (((1,), (0,)), ((), ())),
                preferred_element_type=jnp.float32)
            acc_sc[:, sl] = alpha * acc_sc[:, sl] + pv
            m_sc[h] = m_new

    # skip KV tiles that are entirely past the valid length or fully causal-masked
    active = kv_start < s_true
    if causal:
        active = jnp.logical_and(active, kv_start <= q_start + tq - 1)
    pl.when(active)(_compute)

    @pl.when(ki == n_kv - 1)
    def _finalize():
        parts = []
        for h in range(n_heads):
            inv = pl.reciprocal(l_sc[h], approx=True)          # (tq, 1)
            parts.append(acc_sc[:, h * dk:(h + 1) * dk] * inv)
        o_ref[0] = jnp.concatenate(parts, axis=-1).astype(o_ref.dtype)


def pallas_flash_attention(qkv, n_heads, scale, causal=True,
                           out_dtype=jnp.bfloat16):
    """qkv: (B, S, 3*D) bf16 with Q|K|V packed along the last dim -> (B, S, D)."""
    B, S, threeD = qkv.shape
    D = threeD // 3
    dk = D // n_heads

    # q/kv tile size: big enough to amortize per-step overhead, small enough to
    # keep blocks (and the (tq, tkv) score tile) well inside v7x's 64 MiB VMEM.
    t = 256 if S >= 256 else _round_up(S, 8)
    Sp = _round_up(S, t)
    qkv_p = jnp.pad(qkv, ((0, 0), (0, Sp - S), (0, 0))) if Sp != S else qkv
    n_t = Sp // t

    out_b = jnp.dtype(out_dtype).itemsize
    need = (2 * 2 * t * threeD * 2 + 2 * t * D * out_b
            + (2 * n_heads * t + t * D) * 4 + 6 * t * t * 4)

    kernel = functools.partial(
        _flash_attn_kernel, n_heads=n_heads, d_model=D, dk=dk, scale=scale,
        causal=causal, s_true=S, s_pad=Sp, tq=t, tkv=t)

    out = pl.pallas_call(
        kernel,
        out_shape=jax.ShapeDtypeStruct((B, Sp, D), out_dtype),
        grid=(B, n_t, n_t),
        in_specs=[
            # same qkv array passed twice: q-row view and kv-row view
            pl.BlockSpec((1, t, threeD), lambda b, qi, ki: (b, qi, 0)),
            pl.BlockSpec((1, t, threeD), lambda b, qi, ki: (b, ki, 0)),
        ],
        out_specs=pl.BlockSpec((1, t, D), lambda b, qi, ki: (b, qi, 0)),
        scratch_shapes=[
            pltpu.VMEM((n_heads, t, 1), jnp.float32),   # m (running max)
            pltpu.VMEM((n_heads, t, 1), jnp.float32),   # l (running denom)
            pltpu.VMEM((t, D), jnp.float32),            # acc (all heads)
        ],
        compiler_params=pltpu.CompilerParams(
            dimension_semantics=("parallel", "parallel", "arbitrary"),
            vmem_limit_bytes=_vmem_limit(need),
        ),
    )(qkv_p, qkv_p)

    if Sp != S:
        out = out[:, :S, :]
    return out


# ----------------------------- Model (forward) ------------------------------


def sinusoidal_pos_table(max_len, d_model):
    pos = np.arange(max_len, dtype=np.float32)[:, None]
    div = np.exp(
        np.arange(0, d_model, 2, dtype=np.float32) * -(math.log(10000.0) / d_model)
    )
    pe = np.zeros((max_len, d_model), dtype=np.float32)
    pe[:, 0::2] = np.sin(pos * div)
    pe[:, 1::2] = np.cos(pos * div)
    return jnp.asarray(pe)


def init_params(key, d_model, d_fc, n_heads, n_layers, max_len, vocab_size):
    keys = jax.random.split(key, 2 + 4 * n_layers)
    k_iter = iter(keys)
    scale = 0.02

    def lin(k, d_in, d_out):
        return {
            "w": (jax.random.normal(k, (d_in, d_out), jnp.float32) * scale).astype(
                jnp.bfloat16
            ),
            "b": jnp.zeros((d_out,), jnp.float32),
        }

    params = {
        "token_embedding": jax.random.normal(
            next(k_iter), (vocab_size, d_model), jnp.float32
        )
        * scale,
        "pos_table": sinusoidal_pos_table(max_len, d_model),
        "layers": [],
        "fc": lin(next(k_iter), d_model, vocab_size),
    }
    for _ in range(n_layers):
        layer = {
            # fused QKV projection weight: (D, 3D), Q|K|V packed along columns
            "wqkv": lin(next(k_iter), d_model, 3 * d_model),
            "wo": lin(next(k_iter), d_model, d_model),
            "ff1": lin(next(k_iter), d_model, d_fc),
            "ff2": lin(next(k_iter), d_fc, d_model),
            "ln1_g": jnp.ones((d_model,), jnp.float32),
            "ln1_b": jnp.zeros((d_model,), jnp.float32),
            "ln2_g": jnp.ones((d_model,), jnp.float32),
            "ln2_b": jnp.zeros((d_model,), jnp.float32),
        }
        params["layers"].append(layer)
    return params


def gpt_forward(params, x_ids, n_heads, causal=True):
    B, S = x_ids.shape
    D = params["token_embedding"].shape[1]
    dk = D // n_heads
    scale = 1.0 / math.sqrt(dk)

    # token embedding gather + positional embedding add (glue, f32), then bf16.
    h = jnp.take(params["token_embedding"], x_ids, axis=0)        # (B, S, D)
    h = h + params["pos_table"][None, :S, :]
    h = h.astype(jnp.bfloat16).reshape(B * S, D)

    # TODO(synk): key_padding_mask path not wired (forward default is None).

    for layer in params["layers"]:
        # fused QKV projection: one (B*S, D) x (D, 3D) matmul; the packed
        # result goes straight into the attention kernel (no wrapper split).
        qkv = pallas_linear(h, layer["wqkv"]["w"], layer["wqkv"]["b"])  # (BS, 3D)
        ctx = pallas_flash_attention(
            qkv.reshape(B, S, 3 * D), n_heads, scale, causal=causal)    # (B, S, D)
        ctx = ctx.reshape(B * S, D)

        # output projection fused with residual add + LayerNorm
        h1 = pallas_linear_res_ln(ctx, layer["wo"]["w"], layer["wo"]["b"],
                                  h, layer["ln1_g"], layer["ln1_b"])
        ff = pallas_linear(h1, layer["ff1"]["w"], layer["ff1"]["b"], relu=True)
        # second FFN matmul fused with residual add + LayerNorm
        h = pallas_linear_res_ln(ff, layer["ff2"]["w"], layer["ff2"]["b"],
                                 h1, layer["ln2_g"], layer["ln2_b"])

    # f32 logits to match nn.Linear semantics; pass out_dtype=jnp.bfloat16 here
    # to halve the HBM write of the (M, vocab) tensor if the loss allows it.
    logits = pallas_linear(
        h, params["fc"]["w"], params["fc"]["b"],
        out_dtype=jnp.float32, tn_pref=2048)
    return logits.reshape(B, S, -1)


# ----------------------------------- main -----------------------------------

if __name__ == "__main__":
    d_model, d_fc, n_heads, n_layers = 32, 64, 4, 2
    max_len, vocab_size = 16, 50
    B, S = 2, 8

    key = jax.random.PRNGKey(0)
    k_param, k_tok = jax.random.split(key)
    params = init_params(k_param, d_model, d_fc, n_heads, n_layers, max_len, vocab_size)
    x_ids = jax.random.randint(k_tok, (B, S), 0, vocab_size, dtype=jnp.int32)

    logits = gpt_forward(params, x_ids, n_heads, causal=True)
    logits = jax.block_until_ready(logits)

    assert logits.shape == (B, S, vocab_size), logits.shape
    assert logits.dtype == jnp.float32
    assert bool(jnp.all(jnp.isfinite(logits)))
    print("KERNEL_OK")
</pallas_src>

<mosaic_0001>
module attributes {stable_mosaic.version = 11 : i64} {
  func.func @_matmul_bias_kernel(%arg0: i32, %arg1: i32, %arg2: i32, %arg3: memref<16x128xbf16, #tpu.memory_space<vmem>>, %arg4: memref<128x128xbf16, #tpu.memory_space<vmem>>, %arg5: memref<1x128xf32, #tpu.memory_space<vmem>>, %arg6: memref<16x128xbf16, #tpu.memory_space<vmem>>, %arg7: memref<16x128xf32, #tpu.memory_space<vmem>>) attributes {dimension_semantics = [#tpu.dimension_semantics<parallel>, #tpu.dimension_semantics<parallel>, #tpu.dimension_semantics<arbitrary>], iteration_bounds = array<i64: 1, 1, 1>, scalar_prefetch = 0 : i64, scratch_operands = 1 : i64, tpu.core_type = #tpu.core_type<tc>, window_params = [{transform_indices = @transform_0, window_bounds = array<i64: 16, 128>}, {transform_indices = @transform_1, window_bounds = array<i64: 128, 128>}, {transform_indices = @transform_2, window_bounds = array<i64: 1, 128>}, {transform_indices = @transform_3, window_bounds = array<i64: 16, 128>}]} {
    %c0_i32 = arith.constant 0 : i32
    %0 = arith.cmpi eq, %arg2, %c0_i32 : i32
    %1 = arith.extui %0 : i1 to i32
    %c0_i32_0 = arith.constant 0 : i32
    %2 = arith.cmpi ne, %1, %c0_i32_0 : i32
    scf.if %2 {
      %cst_10 = arith.constant 0.000000e+00 : f32
      %12 = vector.broadcast %cst_10 : f32 to vector<16x128xf32>
      %c0_11 = arith.constant 0 : index
      %c0_12 = arith.constant 0 : index
      %13 = vector.load %arg7[%c0_11, %c0_12] : memref<16x128xf32, #tpu.memory_space<vmem>>, vector<16x128xf32>
      tpu.vector_store %arg7[%c0_11, %c0_12], %12 {strides = array<i32>} : memref<16x128xf32, #tpu.memory_space<vmem>>, vector<16x128xf32>,
    } else {
    }
    %c0 = arith.constant 0 : index
    %c0_1 = arith.constant 0 : index
    %3 = vector.load %arg7[%c0, %c0_1] : memref<16x128xf32, #tpu.memory_space<vmem>>, vector<16x128xf32>
    %c0_2 = arith.constant 0 : index
    %c0_3 = arith.constant 0 : index
    %4 = vector.load %arg3[%c0_2, %c0_3] : memref<16x128xbf16, #tpu.memory_space<vmem>>, vector<16x128xbf16>
    %c0_4 = arith.constant 0 : index
    %c0_5 = arith.constant 0 : index
    %5 = vector.load %arg4[%c0_4, %c0_5] : memref<128x128xbf16, #tpu.memory_space<vmem>>, vector<128x128xbf16>
    %cst = arith.constant dense<0.000000e+00> : vector<16x128xf32>
    %6 = tpu.matmul %4, %5, %cst {dimension_numbers = #tpu.dot_dimension_numbers<[1], [0], [0], [1], [0, 0, 1, 1], [], []>} : vector<16x128xbf16>, vector<128x128xbf16>, vector<16x128xf32> -> vector<16x128xf32>
    %7 = arith.addf %3, %6 : vector<16x128xf32>
    %c0_6 = arith.constant 0 : index
    %c0_7 = arith.constant 0 : index
    %8 = vector.load %arg7[%c0_6, %c0_7] : memref<16x128xf32, #tpu.memory_space<vmem>>, vector<16x128xf32>
    tpu.vector_store %arg7[%c0_6, %c0_7], %7 {strides = array<i32>} : memref<16x128xf32, #tpu.memory_space<vmem>>, vector<16x128xf32>,
    %c0_i32_8 = arith.constant 0 : i32
    %9 = arith.cmpi eq, %arg2, %c0_i32_8 : i32
    %10 = arith.extui %9 : i1 to i32
    %c0_i32_9 = arith.constant 0 : i32
    %11 = arith.cmpi ne, %10, %c0_i32_9 : i32
    scf.if %11 {
      %c0_10 = arith.constant 0 : index
      %c0_11 = arith.constant 0 : index
      %12 = vector.load %arg7[%c0_10, %c0_11] : memref<16x128xf32, #tpu.memory_space<vmem>>, vector<16x128xf32>
      %c0_12 = arith.constant 0 : index
      %c0_13 = arith.constant 0 : index
      %13 = vector.load %arg5[%c0_12, %c0_13] : memref<1x128xf32, #tpu.memory_space<vmem>>, vector<1x128xf32>
      %14 = vector.broadcast %13 : vector<1x128xf32> to vector<16x128xf32>
      %15 = arith.addf %12, %14 : vector<16x128xf32>
      %16 = arith.truncf %15 : vector<16x128xf32> to vector<16x128xbf16>
      %c0_14 = arith.constant 0 : index
      %c0_15 = arith.constant 0 : index
      %17 = vector.load %arg6[%c0_14, %c0_15] : memref<16x128xbf16, #tpu.memory_space<vmem>>, vector<16x128xbf16>
      tpu.vector_store %arg6[%c0_14, %c0_15], %16 {strides = array<i32>} : memref<16x128xbf16, #tpu.memory_space<vmem>>, vector<16x128xbf16>,
    } else {
    }
    return
  }
  func.func @transform_0(%arg0: i32, %arg1: i32, %arg2: i32) -> (i32, i32) {
    %c0_i32 = arith.constant 0 : i32
    return %arg0, %arg2 : i32, i32
  }
  func.func @transform_1(%arg0: i32, %arg1: i32, %arg2: i32) -> (i32, i32) {
    %c0_i32 = arith.constant 0 : i32
    return %arg2, %arg1 : i32, i32
  }
  func.func @transform_2(%arg0: i32, %arg1: i32, %arg2: i32) -> (i32, i32) {
    %c0_i32 = arith.constant 0 : i32
    %c0_i32_0 = arith.constant 0 : i32
    return %c0_i32, %arg1 : i32, i32
  }
  func.func @transform_3(%arg0: i32, %arg1: i32, %arg2: i32) -> (i32, i32) {
    %c0_i32 = arith.constant 0 : i32
    return %arg0, %arg1 : i32, i32
  }
}

</mosaic_0001>

<bundles_post_ra>
// kernel: tpu_custom_call.1
= control target key start
LH: loop header
LB: loop body
LE: loop exit
PB: predicated region body
PF: predicated region fallthrough
CT: control target
= control target key end

     0   :  { %8 = vsyncpa [#allocation4], 0  ;;  %s360_s0 = inlined_call_operand.hbm [shape: bf16[16,128], index: 0, kind: input, shape index: {}]   ;;  %s361_s1 = inlined_call_operand.hbm [shape: bf16[128,128], index: 1, kind: input, shape index: {}]   ;;  %s362_s2 = inlined_call_operand.vmem [shape: f32[1,128], index: 2, kind: input, shape index: {}]   ;;  %s363_s3 = inlined_call_operand.hbm [shape: bf16[16,128], index: 3, kind: output, shape index: {}]  }
   0x1   :  { %9 = vsyncpa [#allocation7], 0 }
   0x2   :  { %10 = vsyncpa [#allocation5], 0  ;;  %s15_s14 = sshll.u32 %s360_s0, 4  ;;  %s314_s15 = smov [#allocation3]   ;;  %s16_s14 = int_to_ptr.hbm [resolvable:$true] %s15_s14 }
   0x3   :  { %s17_s16 = sshll.u32 %s314_s15, 4  ;;  %s28_s19 = sshll.u32 %s361_s1, 4  ;;  %s18_s16 = int_to_ptr.vmem [resolvable:$true] %s17_s16  ;;  %s29_s19 = int_to_ptr.hbm [resolvable:$true] %s28_s19 }
   0x4   :  { %s315_s20 = smov 64   ;;  %s316_s21 = smov 4  }
   0x5   :  { %23 = dma.hbm_to_vmem [thread:$0]  %s16_s14, 128, %s18_s16, [#allocation4], %s315_s20, %s315_s20, %s316_s21  }
   0x6   :  { %s317_s22 = smov [#allocation6]  }
   0x7   :  { %s30_s23 = sshll.u32 %s317_s22, 4  ;;  %s31_s23 = int_to_ptr.vmem [resolvable:$true] %s30_s23 }
   0x8   :  { %36 = dma.hbm_to_vmem [thread:$0]  %s29_s19, 1024, %s31_s23, [#allocation7], %s315_s20, %s315_s20, %s316_s21  }
   0x9   :  { %308 = dma.done.wait [#allocation4], 128  }
   0xa   :  { %309 = vsyncadd [#allocation4], 4294967168 }
   0xb   :  { %310 = dma.done.wait [#allocation7], 1024  }
   0xc   :  { %311 = vsyncadd [#allocation7], 4294966272  ;;  %v224_v0 = vld [vmem:[#allocation6 + $0x38] sm:$0xff]  ;;  %v223_v1 = vld [vmem:[#allocation6 + $0x30] sm:$0xff]  ;;  %s318_s24 = smov [#allocation8]   ;;  %s166_s28 = sshll.u32 %s363_s3, 4  ;;  %s167_s28 = int_to_ptr.hbm [resolvable:$true] %s166_s28 }
   0xd   :  { %127 = vmatpush.bf16.msra.mxu0 %v224_v0  ;;  %v222_v2 = vld [vmem:[#allocation6 + $0x28] sm:$0xff]  ;;  %v221_v3 = vld [vmem:[#allocation6 + $0x20] sm:$0xff]  ;;  %v220_v4 = vld [vmem:[#allocation6 + $0x18] sm:$0xff]  ;;  %s164_s25 = sshll.u32 %s318_s24, 4  ;;  %s165_s25 = int_to_ptr.vmem [resolvable:$true] %s164_s25 }
   0xe   :  { %v219_v5 = vld [vmem:[#allocation6 + $0x10] sm:$0xff]  ;;  %v218_v6 = vld [vmem:[#allocation6 + $0x8] sm:$0xff]  ;;  %v217_v7 = vld [vmem:[#allocation6] sm:$0xff] }
   0xf   :  { %v216_v8 = vld [vmem:[#allocation3] sm:$0xff] }
  0x10   :  { %v235_v10 = vld [vmem:[%s362_s2] ss:$0 sm:$0xff] }
  0x11   :  { %128 = vmatpush.bf16.msra.mxu0 %v223_v1 }
  0x15   :  { %129 = vmatpush.bf16.msra.mxu0 %v222_v2 }
  0x19   :  { %130 = vmatpush.bf16.msra.mxu0 %v221_v3 }
  0x1d   :  { %131 = vmatpush.bf16.msra.mxu0 %v220_v4 }
  0x21   :  { %132 = vmatpush.bf16.msra.mxu0 %v219_v5 }
  0x25   :  { %133 = vmatpush.bf16.msra.mxu0 %v218_v6 }
  0x29   :  { %134 = vmatpush.bf16.msra.mxu0 %v217_v7 }
  0x2c   :  { %135 = vmatmul.bf16.vlgmr.msra.gmra.mxu0 %v216_v8 }
  0xa9   :  { %v136_v9 = vpop.f32.mrf.mxu0 }
  0xaa   :  { %v154_v12 = vadd.f32 %v235_v10, %v136_v9 }
  0xb1   :  { %v138_v11 = vpop.f32.mrf.mxu0 }
  0xb2   :  { %v155_v13 = vadd.f32 %v235_v10, %v138_v11 }
  0xb4   :  { %v228_v14 = vpack.c.bf16 %v155_v13, %v154_v12 }
  0xb6   :  { %229 = vst [vmem:[#allocation8] sm:$0xff] %v228_v14  }
  0xb7   :  { %172 = dma.vmem_to_hbm [thread:$0]  %s165_s25, 128, %s167_s28, [#allocation5], %s315_s20, %s315_s20, %s316_s21  }
  0xb8   :  { %312 = dma.done.wait [#allocation5], 128  }
  0xb9   :  { %313 = vsyncadd [#allocation5], 4294967168 }
  0xba   :  { %177 = vsyncpa [#allocation4], 1 }
  0xbb   :  { %178 = vsyncpa [#allocation7], 1 }
  0xbc   :  { %179 = vsyncpa [#allocation5], 1 }

</bundles_post_ra>
